<compile_context>
chip_gen: v6e
topology: v6e:2x2x1
jax: 0.10.0
libtpu: 0.0.40
codegen_flags: <defaults>
</compile_context>

<pallas_src>
import jax
import jax.numpy as jnp
from jax.experimental import pallas as pl
from jax.experimental.pallas import tpu as pltpu


def _proto_dist_kernel(x_ref, pt_ref, xn_ref, pn_ref, o_ref):
    # x_ref : (tm, C)   row tile of inputs (native dtype)
    # pt_ref: (C, tp)   pre-transposed prototype tile (native dtype, lane-dense)
    # xn_ref: (tm, 1)   hoisted ||x||^2 (f32)
    # pn_ref: (1, tp)   hoisted ||p||^2 (f32)
    # o_ref : (tm, tp)  squared-distance tile
    cross = jnp.dot(x_ref[...], pt_ref[...], preferred_element_type=jnp.float32)
    o_ref[...] = (xn_ref[...] - 2.0 * cross + pn_ref[...]).astype(o_ref.dtype)


def _round_up(a: int, b: int) -> int:
    return (a + b - 1) // b * b


def _pick_tile(dim: int, align: int, cap: int):
    """Pick tile (multiple of `align`, <= cap) minimizing padded extent;
    ties broken toward the larger tile (fewer grid steps)."""
    hi = max(align, min(max(cap, align), _round_up(max(dim, 1), align)))
    best_t, best_pad = align, _round_up(max(dim, 1), align)
    for t in range(align, hi + 1, align):
        pad = _round_up(dim, t)
        if pad < best_pad or (pad == best_pad and t > best_t):
            best_t, best_pad = t, pad
    return best_t, best_pad


def _reference(x, prototypes):
    xx = jnp.sum(x * x, axis=1, keepdims=True)            # (N, 1)
    pp = jnp.sum(prototypes * prototypes, axis=1)[None]   # (1, P)
    return xx + pp - 2.0 * (x @ prototypes.T)


def prototype_layer(x: jax.Array, prototypes: jax.Array, *,
                    tm_cap: int = 512, tp_cap: int = 512,
                    out_dtype=jnp.float32, use_pallas=None,
                    vmem_budget_bytes: int = 14 * 1024 * 1024) -> jax.Array:
    """Pairwise squared Euclidean distances between rows of x and prototypes."""
    N, C = x.shape
    P, C2 = prototypes.shape
    assert C == C2, "channel mismatch"

    # Small-problem fallback: one tiny padded tile isn't worth a kernel launch.
    if use_pallas is None:
        use_pallas = (N * P) >= (128 * 128)
    if not use_pallas:
        return _reference(x, prototypes).astype(out_dtype)

    cdt = jnp.promote_types(x.dtype, prototypes.dtype)
    in_bytes = jnp.dtype(cdt).itemsize
    out_bytes = jnp.dtype(out_dtype).itemsize

    # Shrink tile caps so the double-buffered working set fits a conservative
    # VMEM budget (safe on v5e 16 MiB scoped default and v7x 64 MiB physical).
    # TODO(synk): for very large C add a K-reduction grid axis ('arbitrary')
    # with an f32 VMEM accumulator instead of shrinking the row/proto tiles.
    while (2 * (tm_cap * C + C * tp_cap) * in_bytes
           + 2 * tm_cap * tp_cap * out_bytes) > vmem_budget_bytes:
        if tm_cap > 64:
            tm_cap //= 2
        elif tp_cap > 128:
            tp_cap //= 2
        else:
            break

    # Minimal-padding tile selection (tm | n_pad, tp | p_pad by construction).
    tm, n_pad = _pick_tile(N, 8, tm_cap)
    tp, p_pad = _pick_tile(P, 128, tp_cap)

    x_p = x.astype(cdt)
    if n_pad != N:
        x_p = jnp.pad(x_p, ((0, n_pad - N), (0, 0)))
    pr_p = prototypes.astype(cdt)
    if p_pad != P:
        pr_p = jnp.pad(pr_p, ((0, p_pad - P), (0, 0)))

    # Hoisted squared norms (computed once, outside the grid loop) and
    # pre-transposed prototypes so the prototype tile is lane-dense.
    xn = jnp.sum(x_p.astype(jnp.float32) ** 2, axis=-1, keepdims=True)   # (n_pad, 1)
    pn = jnp.sum(pr_p.astype(jnp.float32) ** 2, axis=-1)[None, :]        # (1, p_pad)
    pt = pr_p.T                                                          # (C, p_pad)

    grid = (n_pad // tm, p_pad // tp)

    cost = pl.CostEstimate(
        flops=2 * n_pad * p_pad * C,
        transcendentals=0,
        bytes_accessed=(n_pad * C + C * p_pad) * in_bytes
        + n_pad * p_pad * out_bytes + 4 * (n_pad + p_pad),
    )

    out = pl.pallas_call(
        _proto_dist_kernel,
        out_shape=jax.ShapeDtypeStruct((n_pad, p_pad), out_dtype),
        grid_spec=pl.GridSpec(
            grid=grid,
            in_specs=[
                pl.BlockSpec((tm, C), lambda i, j: (i, 0)),   # x row tile
                pl.BlockSpec((C, tp), lambda i, j: (0, j)),   # prototypes^T tile
                pl.BlockSpec((tm, 1), lambda i, j: (i, 0)),   # hoisted ||x||^2
                pl.BlockSpec((1, tp), lambda i, j: (0, j)),   # hoisted ||p||^2
            ],
            out_specs=pl.BlockSpec((tm, tp), lambda i, j: (i, j)),
        ),
        compiler_params=pltpu.CompilerParams(
            dimension_semantics=("parallel", "parallel"),
        ),
        cost_estimate=cost,
    )(x_p, pt, xn, pn)

    return out[:N, :P]


if __name__ == "__main__":
    # Module defaults: in_channels=10, num_prototypes=15.
    in_channels = 10
    num_prototypes = 15
    batch = 16

    k_x, k_p, k_x2, k_p2 = jax.random.split(jax.random.PRNGKey(0), 4)

    x = jax.random.normal(k_x, (batch, in_channels), dtype=jnp.float32)
    # torch.rand -> uniform[0, 1)
    prototypes = jax.random.uniform(k_p, (num_prototypes, in_channels),
                                    dtype=jnp.float32)

    # Module-default shape, forced through the Pallas kernel.
    out = jax.block_until_ready(prototype_layer(x, prototypes, use_pallas=True))
    ref = _reference(x, prototypes)
    assert out.shape == (batch, num_prototypes)
    assert jnp.allclose(out, ref, atol=1e-4, rtol=1e-4), "mismatch (tiny case)"

    # Awkward larger shape to exercise tile selection / padding (auto path).
    x2 = jax.random.normal(k_x2, (264, 40), dtype=jnp.float32)
    p2 = jax.random.uniform(k_p2, (200, 40), dtype=jnp.float32)
    out2 = jax.block_until_ready(prototype_layer(x2, p2))
    assert out2.shape == (264, 200)
    assert jnp.allclose(out2, _reference(x2, p2), atol=1e-3, rtol=1e-3), \
        "mismatch (big case)"

    print("KERNEL_OK")
</pallas_src>

<mosaic_0001>
module attributes {stable_mosaic.version = 11 : i64} {
  func.func @_proto_dist_kernel(%arg0: i32, %arg1: i32, %arg2: memref<16x10xf32, #tpu.memory_space<vmem>>, %arg3: memref<10x128xf32, #tpu.memory_space<vmem>>, %arg4: memref<16x1xf32, #tpu.memory_space<vmem>>, %arg5: memref<1x128xf32, #tpu.memory_space<vmem>>, %arg6: memref<16x128xf32, #tpu.memory_space<vmem>>) attributes {dimension_semantics = [#tpu.dimension_semantics<parallel>, #tpu.dimension_semantics<parallel>], iteration_bounds = array<i64: 1, 1>, scalar_prefetch = 0 : i64, scratch_operands = 0 : i64, tpu.core_type = #tpu.core_type<tc>, window_params = [{transform_indices = @transform_0, window_bounds = array<i64: 16, 10>}, {transform_indices = @transform_1, window_bounds = array<i64: 10, 128>}, {transform_indices = @transform_2, window_bounds = array<i64: 16, 1>}, {transform_indices = @transform_3, window_bounds = array<i64: 1, 128>}, {transform_indices = @transform_4, window_bounds = array<i64: 16, 128>}]} {
    %c0 = arith.constant 0 : index
    %c0_0 = arith.constant 0 : index
    %0 = vector.load %arg2[%c0, %c0_0] : memref<16x10xf32, #tpu.memory_space<vmem>>, vector<16x10xf32>
    %c0_1 = arith.constant 0 : index
    %c0_2 = arith.constant 0 : index
    %1 = vector.load %arg3[%c0_1, %c0_2] : memref<10x128xf32, #tpu.memory_space<vmem>>, vector<10x128xf32>
    %cst = arith.constant dense<0.000000e+00> : vector<16x128xf32>
    %2 = tpu.matmul %0, %1, %cst {dimension_numbers = #tpu.dot_dimension_numbers<[1], [0], [0], [1], [0, 0, 1, 1], [], []>} : vector<16x10xf32>, vector<10x128xf32>, vector<16x128xf32> -> vector<16x128xf32>
    %c0_3 = arith.constant 0 : index
    %c0_4 = arith.constant 0 : index
    %3 = vector.load %arg4[%c0_3, %c0_4] : memref<16x1xf32, #tpu.memory_space<vmem>>, vector<16x1xf32>
    %cst_5 = arith.constant 2.000000e+00 : f32
    %4 = vector.broadcast %cst_5 : f32 to vector<16x128xf32>
    %5 = arith.mulf %4, %2 : vector<16x128xf32>
    %6 = vector.broadcast %3 : vector<16x1xf32> to vector<16x128xf32>
    %7 = arith.subf %6, %5 : vector<16x128xf32>
    %c0_6 = arith.constant 0 : index
    %c0_7 = arith.constant 0 : index
    %8 = vector.load %arg5[%c0_6, %c0_7] : memref<1x128xf32, #tpu.memory_space<vmem>>, vector<1x128xf32>
    %9 = vector.broadcast %8 : vector<1x128xf32> to vector<16x128xf32>
    %10 = arith.addf %7, %9 : vector<16x128xf32>
    %c0_8 = arith.constant 0 : index
    %c0_9 = arith.constant 0 : index
    %11 = vector.load %arg6[%c0_8, %c0_9] : memref<16x128xf32, #tpu.memory_space<vmem>>, vector<16x128xf32>
    tpu.vector_store %arg6[%c0_8, %c0_9], %10 {strides = array<i32>} : memref<16x128xf32, #tpu.memory_space<vmem>>, vector<16x128xf32>,
    return
  }
  func.func @transform_0(%arg0: i32, %arg1: i32) -> (i32, i32) {
    %c0_i32 = arith.constant 0 : i32
    %c0_i32_0 = arith.constant 0 : i32
    return %arg0, %c0_i32 : i32, i32
  }
  func.func @transform_1(%arg0: i32, %arg1: i32) -> (i32, i32) {
    %c0_i32 = arith.constant 0 : i32
    %c0_i32_0 = arith.constant 0 : i32
    return %c0_i32, %arg1 : i32, i32
  }
  func.func @transform_2(%arg0: i32, %arg1: i32) -> (i32, i32) {
    %c0_i32 = arith.constant 0 : i32
    %c0_i32_0 = arith.constant 0 : i32
    return %arg0, %c0_i32 : i32, i32
  }
  func.func @transform_3(%arg0: i32, %arg1: i32) -> (i32, i32) {
    %c0_i32 = arith.constant 0 : i32
    %c0_i32_0 = arith.constant 0 : i32
    return %c0_i32, %arg1 : i32, i32
  }
  func.func @transform_4(%arg0: i32, %arg1: i32) -> (i32, i32) {
    %c0_i32 = arith.constant 0 : i32
    return %arg0, %arg1 : i32, i32
  }
}

</mosaic_0001>

<bundles_post_ra>
// kernel: tpu_custom_call.1
= control target key start
LH: loop header
LB: loop body
LE: loop exit
PB: predicated region body
PF: predicated region fallthrough
CT: control target
= control target key end

     0   :  { %9 = vsyncpa [#allocation3], 0  ;;  %s288_s0 = inlined_call_operand.vmem [shape: f32[16,10], index: 0, kind: input, shape index: {}]   ;;  %s289_s1 = inlined_call_operand.hbm [shape: f32[10,128], index: 1, kind: input, shape index: {}]   ;;  %s290_s2 = inlined_call_operand.vmem [shape: f32[16,1], index: 2, kind: input, shape index: {}]   ;;  %s291_s3 = inlined_call_operand.vmem [shape: f32[1,128], index: 3, kind: input, shape index: {}]   ;;  %s292_s4 = inlined_call_operand.hbm [shape: f32[16,128], index: 4, kind: output, shape index: {}]  }
   0x1   :  { %10 = vsyncpa [#allocation4], 0  ;;  %s231_s15 = smov [#allocation2]  }
   0x2   :  { %s18_s16 = sshll.u32 %s231_s15, 4  ;;  %s19_s16 = int_to_ptr.vmem [resolvable:$true] %s18_s16 }
   0x3   :  { %s195_s17 = scalar_lea.vmem %s19_s16, 256  ;;  %p200_p1 = scmp.lt.s32.totalorder %s19_s16, %s19_s16 }
   0x4   :  { %p196_p0 = scmp.ne.s32.totalorder %s19_s16, %s195_s17  ;;  %p201_p2 = scmp.lt.s32.totalorder %s195_s17, %s195_s17 }
   0x6   :  { %p202_p3 = por %p201_p2, %p200_p1 }
   0x8   :  { %p203_p4 = pnand %p202_p3, %p196_p0 }
   0xa   :  { %206 = shalt.err (!%p203_p4)
}
   0xb   :  { %s232_s18 = smov 128   ;;  %s233_s19 = smov 8  }
   0xc   :  { %24 = dma.hbm_to_vmem [thread:$0]  %s289_s1, 256, %s19_s16, [#allocation3], %s232_s18, %s232_s18, %s233_s19  }
   0xd   :  { %227 = dma.done.wait [#allocation3], 256  }
   0xe   :  { %228 = vsyncadd [#allocation3], 4294967040  ;;  %v234_v0 = vmov 0   ;;  %vm43_vm0 = vcmask 1041408   ;;  %vm36_vm1 = vcmask 80896   ;;  %v34_v2 = vld [vmem:[#allocation2] sm:$0xff] }
   0xf   :  { %186 = vset.pattern.permute.xlu0 %v234_v0  ;;  %v35_v1 = vld [vmem:[#allocation2 + $0x8] sm:$0x3]  ;;  %v32_v3 = vld [vmem:[%s288_s0] sm:$0xff] }
  0x10   :  { %174 = vmatprep.subr.msk.mxu0 %vm43_vm0, %v35_v1  ;;  %178 = vmatprep.mubr.msk.f32.mxu0 %vm36_vm1, %v32_v3  ;;  %v122_v4 = vld [vmem:[%s290_s2] sm:$0xff]  ;;  %v33_v5 = vld [vmem:[%s288_s0 + $0x8] sm:$0xff]  ;;  %s235_s0 = smov [#allocation5]  }
  0x11   :  { %175 = vmatpush3.msk.msra.mxu0 %vm43_vm0, %v35_v1  ;;  %128 = vperm.xlu0 %186, %v122_v4   ;;  %v123_v6 = vld [vmem:[%s290_s2 + $0x8] sm:$0xff]  ;;  %v169_v11 = vld [vmem:[%s291_s3] ss:$0 sm:$0xff]  ;;  %s154_s5 = sshll.u32 %s235_s0, 4  ;;  %s155_s5 = int_to_ptr.vmem [resolvable:$true] %s154_s5 }
  0x12   :  { %176 = vmatprep.subr.mxu0 %v34_v2  ;;  %s207_s2 = scalar_lea.vmem %s155_s5, 256  ;;  %p212_p6 = scmp.lt.s32.totalorder %s155_s5, %s155_s5 }
  0x13   :  { %177 = vmatpush3.msra.mxu0 %v34_v2  ;;  %p208_p5 = scmp.ne.s32.totalorder %s155_s5, %s207_s2  ;;  %p213_p7 = scmp.lt.s32.totalorder %s207_s2, %s207_s2 }
  0x14   :  { %179 = vmatmul.mubr.msk.f32.vlgmr.msra.gmra.mxu0 %vm36_vm1, %v33_v5 }
  0x15   :  { %133 = vperm.xlu0 %186, %v123_v6   ;;  %p214_p8 = por %p213_p7, %p212_p6 }
  0x17   :  { %p215_p9 = pnand %p214_p8, %p208_p5 }
  0x8c   :  { %v129_v7 = vpop.permute.xlu0 %128 }
  0x90   :  { %v134_v10 = vpop.permute.xlu0 %133 }
  0xd4   :  { %v180_v8 = vpop.f32.mrf.mxu0 }
  0xd5   :  { %v125_v9 = vmul.f32 2.0, %v180_v8 }
  0xd6   :  { %v113_v12 = vpop.f32.mrf.mxu0 }
  0xd7   :  { %v137_v13 = vsub.f32 %v134_v10, %v125_v9  ;;  %v124_v14 = vmul.f32 2.0, %v113_v12 }
  0xd9   :  { %v146_v15 = vadd.f32 %v169_v11, %v137_v13  ;;  %v136_v16 = vsub.f32 %v129_v7, %v124_v14 }
  0xdb   :  { %148 = vst [vmem:[#allocation5 + $0x8] sm:$0xff] %v146_v15  ;;  %v145_v17 = vadd.f32 %v169_v11, %v136_v16 }
  0xdd   :  { %147 = vst [vmem:[#allocation5] sm:$0xff] %v145_v17 }
  0xde   :  { %218 = shalt.err (!%p215_p9)
}
  0xdf   :  { %160 = dma.vmem_to_hbm [thread:$0]  %s155_s5, 256, %s292_s4, [#allocation4], %s232_s18, %s232_s18, %s233_s19  }
  0xe0   :  { %229 = dma.done.wait [#allocation4], 256  }
  0xe1   :  { %230 = vsyncadd [#allocation4], 4294967040 }
  0xe2   :  { %164 = vsyncpa [#allocation3], 1 }
  0xe3   :  { %165 = vsyncpa [#allocation4], 1 }

</bundles_post_ra>
